<compile_context>
chip_gen: v6e
topology: v6e:2x2x1
jax: 0.10.0
libtpu: 0.0.40
codegen_flags: <defaults>
</compile_context>

<pallas_src>
import functools
import math

import jax
import jax.numpy as jnp
from jax.experimental import pallas as pl
from jax.experimental.pallas import tpu as pltpu


# TODO(synk): TimeVocab.SPECIAL_TOKEN_MASK value is not given in the spec; 0 is used here.
SPECIAL_TOKEN_MASK = 0


# ----------------------------------------------------------------------------
# Pallas kernel: out = dropout(x + var_table[idx] + pos) * scale  over row tiles
# ----------------------------------------------------------------------------
def _embed_kernel(idx_ref, x_ref, pos_ref, tbl_ref, o_ref, *,
                  dropout_p, training, scale, seed_mix, gather_onehot):
    rows, D = x_ref.shape
    V = tbl_ref.shape[0]

    idx = idx_ref[...]                       # (rows, 1) int32
    x = x_ref[...].astype(jnp.float32)       # (rows, D)
    pos = pos_ref[...].astype(jnp.float32)   # (rows, D)

    if gather_onehot:
        # Large vocab: one-hot @ table on the MXU.
        oh = (jax.lax.broadcasted_iota(jnp.int32, (rows, V), 1) == idx
              ).astype(jnp.float32)
        var_emb = jnp.dot(oh, tbl_ref[...].astype(jnp.float32),
                          preferred_element_type=jnp.float32)
    else:
        # Small vocab: VPU multiply-accumulate gather (table is VMEM resident).
        tbl = tbl_ref[...].astype(jnp.float32)        # (V, D)
        var_emb = jnp.zeros((rows, D), jnp.float32)
        for v in range(V):                            # unrolled, V is small
            sel = (idx == v).astype(jnp.float32)      # (rows, 1)
            var_emb = var_emb + sel * tbl[v:v + 1, :] # broadcast (rows,1)*(1,D)

    out = x + var_emb + pos

    if training and dropout_p > 0.0:
        # Inverted dropout via a counter-based integer hash (pure VPU jnp ops,
        # works on TPU HW and in interpret mode; deterministic per element).
        row0 = pl.program_id(0) * rows
        r = (row0 + jax.lax.broadcasted_iota(jnp.int32, (rows, D), 0)
             ).astype(jnp.uint32)
        c = jax.lax.broadcasted_iota(jnp.int32, (rows, D), 1).astype(jnp.uint32)
        h = (r * jnp.uint32(0x9E3779B1)
             + c * jnp.uint32(0x85EBCA77)
             + jnp.uint32(seed_mix))
        h = h ^ (h >> 16)
        h = h * jnp.uint32(0x7FEB352D)
        h = h ^ (h >> 15)
        h = h * jnp.uint32(0x846CA68B)
        h = h ^ (h >> 16)
        thresh = jnp.uint32(min(int(dropout_p * 4294967296.0), 0xFFFFFFFF))
        keep = h >= thresh                            # P(keep) = 1 - p
        out = jnp.where(keep, out * (scale / (1.0 - dropout_p)), 0.0)
    else:
        if scale != 1.0:
            out = out * scale

    o_ref[...] = out.astype(o_ref.dtype)


# ----------------------------------------------------------------------------
# Wrapper
# ----------------------------------------------------------------------------
def _round_up(x, m):
    return (x + m - 1) // m * m


def clibert_embedding_forward(x, variable_seq, pos_emb, var_table, *,
                              dropout_p=0.1, training=False, seed=0,
                              scale=1.0, out_dtype=None, row_tile=None):
    """Fused CliBERT embedding stage.

    x:            [B, S, D] float
    variable_seq: [B, S]    int   (indices into var_table)
    pos_emb:      [B, S, D] or [1, S, D] float
    var_table:    [V, D]    float (VariableEmbedding.weight)
    returns       [B, S, D] = dropout(x + var_table[variable_seq] + pos_emb) * scale
    """
    B, S, D = x.shape
    V = var_table.shape[0]
    if out_dtype is None:
        out_dtype = x.dtype

    if pos_emb.shape[0] != B:
        pos_emb = jnp.broadcast_to(pos_emb, (B, S, D))

    # Flatten to a lane-dense (N, D) row view (pure memory-streaming op).
    N = B * S
    x2 = x.reshape(N, D)
    pos2 = pos_emb.reshape(N, D)
    idx2 = variable_seq.astype(jnp.int32).reshape(N, 1)

    # ---- row-tile selection -------------------------------------------------
    # ~1 MiB per operand block keeps 2-deep double buffering of (x, pos, out, idx)
    # well inside the default scoped VMEM limit on v5e/v6e/v7x.
    if row_tile is None:
        target_block_bytes = 1 << 20
        row_tile = max(8, min(1024, (target_block_bytes // (4 * D)) // 8 * 8))
    row_tile = min(row_tile, _round_up(N, 8))
    if N >= 16:
        # Ensure >= 2 grid steps so both v7x TensorCores get work.
        row_tile = min(row_tile, _round_up((N + 1) // 2, 8))
    row_tile = max(8, row_tile)

    Np = _round_up(N, row_tile)
    if Np != N:
        pad = Np - N
        x2 = jnp.pad(x2, ((0, pad), (0, 0)))
        pos2 = jnp.pad(pos2, ((0, pad), (0, 0)))
        idx2 = jnp.pad(idx2, ((0, pad), (0, 0)))   # index 0 is valid; rows sliced off

    grid = (Np // row_tile,)
    gather_onehot = V > 32   # MXU one-hot path only for large vocabularies
    seed_mix = (int(seed) * 0x9E3779B9 + 0x1234567) & 0xFFFFFFFF

    kernel = functools.partial(_embed_kernel,
                               dropout_p=float(dropout_p),
                               training=bool(training),
                               scale=float(scale),
                               seed_mix=seed_mix,
                               gather_onehot=gather_onehot)

    # Advisory cost estimate: this op is HBM-bound.
    bytes_accessed = 4 * (x2.size + pos2.size + Np * D + idx2.size + var_table.size)
    flops = 2 * Np * V * D if gather_onehot else 3 * Np * V * D

    out = pl.pallas_call(
        kernel,
        out_shape=jax.ShapeDtypeStruct((Np, D), out_dtype),
        grid=grid,
        in_specs=[
            pl.BlockSpec((row_tile, 1), lambda i: (i, 0)),   # indices
            pl.BlockSpec((row_tile, D), lambda i: (i, 0)),   # x rows
            pl.BlockSpec((row_tile, D), lambda i: (i, 0)),   # pos rows
            pl.BlockSpec((V, D), lambda i: (0, 0)),          # embedding table
        ],
        out_specs=pl.BlockSpec((row_tile, D), lambda i: (i, 0)),
        compiler_params=pltpu.CompilerParams(
            dimension_semantics=("parallel",)),
        cost_estimate=pl.CostEstimate(flops=int(flops), transcendentals=0,
                                      bytes_accessed=int(bytes_accessed)),
    )(idx2, x2, pos2, var_table)

    return out[:N].reshape(B, S, D)


# ----------------------------------------------------------------------------
# Host-side helpers replicating CliBERT's get_var_seq / positional_encoding
# ----------------------------------------------------------------------------
def get_var_seq(var_list, src_id):
    """var_list: [Vl] int, src_id: [B, T] int -> [B, T*Vl] int."""
    B, T = src_id.shape
    Vl = var_list.shape[0]
    tiled = jnp.broadcast_to(var_list[None, None, :], (B, T, Vl))
    masked = jnp.where((src_id == SPECIAL_TOKEN_MASK)[:, :, None],
                       SPECIAL_TOKEN_MASK, tiled)
    return masked.reshape(B, T * Vl)


def positional_encoding(batch, time_len, var_len, d_model):
    position = jnp.arange(time_len, dtype=jnp.float32)[:, None]
    div_term = jnp.exp(jnp.arange(0, d_model, 2, dtype=jnp.float32)
                       * (-math.log(10000.0) / d_model))
    pe = jnp.zeros((time_len, d_model), jnp.float32)
    pe = pe.at[:, 0::2].set(jnp.sin(position * div_term))
    pe = pe.at[:, 1::2].set(jnp.cos(position * div_term))
    pe = jnp.repeat(pe, var_len, axis=0)                 # repeat_interleave(dim=time)
    return jnp.broadcast_to(pe[None], (batch, time_len * var_len, d_model))


# ----------------------------------------------------------------------------
# Demo / correctness check
# ----------------------------------------------------------------------------
if __name__ == "__main__":
    # Small shapes consistent with CliBERT's forward:
    #   x: (batch, time_len, n_vars, in_dim) -> viewed to (batch, S=time_len*n_vars, in_dim)
    B, time_len, n_vars, D = 2, 4, 4, 128
    max_var_len = 8                      # vocab of VariableEmbedding
    S = time_len * n_vars

    key = jax.random.PRNGKey(0)
    k1, k2, k3, k4 = jax.random.split(key, 4)

    x4 = jax.random.normal(k1, (B, time_len, n_vars, D), jnp.float32)
    var_list = jnp.array([1, 3, 5, 7], dtype=jnp.int32)                 # n_vars entries
    src_id = jax.random.randint(k2, (B, time_len), 1, 5)                # no mask tokens
    var_table = jax.random.normal(k3, (max_var_len, D), jnp.float32)    # nn.Embedding init

    var_seq = get_var_seq(var_list, src_id)                             # (B, S)
    pos = positional_encoding(B, time_len, n_vars, D)                   # (B, S, D)
    x3 = x4.reshape(B, S, D)
    scale = math.sqrt(D)                                                # * sqrt(in_dim)

    # ---- eval mode (dropout = identity): exact check against pure JAX -------
    out = clibert_embedding_forward(x3, var_seq, pos, var_table,
                                    dropout_p=0.1, training=False, scale=scale)
    out = jax.block_until_ready(out)

    ref = (x3 + var_table[var_seq] + pos) * scale
    assert out.shape == (B, S, D)
    assert jnp.allclose(out, ref, atol=1e-4, rtol=1e-5), "eval-mode mismatch"

    # ---- training mode: check inverted-dropout semantics ---------------------
    # (mask stream uses an in-kernel hash PRNG, so it will not bit-match torch's
    #  RNG; statistics and the keep/zero structure are checked instead.)
    p = 0.5
    out_tr = clibert_embedding_forward(x3, var_seq, pos, var_table,
                                       dropout_p=p, training=True, seed=123,
                                       scale=scale)
    out_tr = jax.block_until_ready(out_tr)
    ref_kept = ref * (1.0 / (1.0 - p))
    near_zero = jnp.abs(out_tr) < 1e-6
    near_kept = jnp.abs(out_tr - ref_kept) <= 1e-3 * (1.0 + jnp.abs(ref_kept))
    assert bool(jnp.all(near_zero | near_kept)), "training-mode values malformed"
    drop_frac = float(jnp.mean(near_zero.astype(jnp.float32)))
    assert 0.3 < drop_frac < 0.7, f"drop fraction {drop_frac} far from p={p}"

    print("KERNEL_OK")
</pallas_src>

<mosaic_0001>
module attributes {stable_mosaic.version = 11 : i64} {
  func.func @_embed_kernel(%arg0: i32, %arg1: memref<16x1xi32, #tpu.memory_space<vmem>>, %arg2: memref<16x128xf32, #tpu.memory_space<vmem>>, %arg3: memref<16x128xf32, #tpu.memory_space<vmem>>, %arg4: memref<8x128xf32, #tpu.memory_space<vmem>>, %arg5: memref<16x128xf32, #tpu.memory_space<vmem>>) attributes {dimension_semantics = [#tpu.dimension_semantics<parallel>], iteration_bounds = array<i64: 2>, scalar_prefetch = 0 : i64, scratch_operands = 0 : i64, tpu.core_type = #tpu.core_type<tc>, window_params = [{transform_indices = @transform_0, window_bounds = array<i64: 16, 1>}, {transform_indices = @transform_1, window_bounds = array<i64: 16, 128>}, {transform_indices = @transform_2, window_bounds = array<i64: 16, 128>}, {pipeline_mode = #tpu.pipeline_mode<synchronous>, transform_indices = @transform_3, window_bounds = array<i64: 8, 128>}, {transform_indices = @transform_4, window_bounds = array<i64: 16, 128>}]} {
    %c0 = arith.constant 0 : index
    %c0_0 = arith.constant 0 : index
    %0 = vector.load %arg1[%c0, %c0_0] : memref<16x1xi32, #tpu.memory_space<vmem>>, vector<16x1xi32>
    %c0_1 = arith.constant 0 : index
    %c0_2 = arith.constant 0 : index
    %1 = vector.load %arg2[%c0_1, %c0_2] : memref<16x128xf32, #tpu.memory_space<vmem>>, vector<16x128xf32>
    %c0_3 = arith.constant 0 : index
    %c0_4 = arith.constant 0 : index
    %2 = vector.load %arg3[%c0_3, %c0_4] : memref<16x128xf32, #tpu.memory_space<vmem>>, vector<16x128xf32>
    %c0_5 = arith.constant 0 : index
    %c0_6 = arith.constant 0 : index
    %3 = vector.load %arg4[%c0_5, %c0_6] : memref<8x128xf32, #tpu.memory_space<vmem>>, vector<8x128xf32>
    %cst = arith.constant 0.000000e+00 : f32
    %4 = vector.broadcast %cst : f32 to vector<16x128xf32>
    %c0_i32 = arith.constant 0 : i32
    %5 = vector.broadcast %c0_i32 : i32 to vector<16x1xi32>
    %6 = arith.cmpi eq, %0, %5 : vector<16x1xi32>
    %7 = arith.extui %6 : vector<16x1xi1> to vector<16x1xi32>
    %8 = arith.sitofp %7 : vector<16x1xi32> to vector<16x1xf32>
    %9 = vector.extract_strided_slice %3 {offsets = [0, 0], sizes = [1, 128], strides = [1, 1]} : vector<8x128xf32> to vector<1x128xf32>
    %10 = vector.broadcast %8 : vector<16x1xf32> to vector<16x128xf32>
    %11 = vector.broadcast %9 : vector<1x128xf32> to vector<16x128xf32>
    %12 = arith.mulf %10, %11 : vector<16x128xf32>
    %13 = arith.addf %4, %12 : vector<16x128xf32>
    %c1_i32 = arith.constant 1 : i32
    %14 = vector.broadcast %c1_i32 : i32 to vector<16x1xi32>
    %15 = arith.cmpi eq, %0, %14 : vector<16x1xi32>
    %16 = arith.extui %15 : vector<16x1xi1> to vector<16x1xi32>
    %17 = arith.sitofp %16 : vector<16x1xi32> to vector<16x1xf32>
    %18 = vector.extract_strided_slice %3 {offsets = [1, 0], sizes = [1, 128], strides = [1, 1]} : vector<8x128xf32> to vector<1x128xf32>
    %19 = vector.broadcast %17 : vector<16x1xf32> to vector<16x128xf32>
    %20 = vector.broadcast %18 : vector<1x128xf32> to vector<16x128xf32>
    %21 = arith.mulf %19, %20 : vector<16x128xf32>
    %22 = arith.addf %13, %21 : vector<16x128xf32>
    %c2_i32 = arith.constant 2 : i32
    %23 = vector.broadcast %c2_i32 : i32 to vector<16x1xi32>
    %24 = arith.cmpi eq, %0, %23 : vector<16x1xi32>
    %25 = arith.extui %24 : vector<16x1xi1> to vector<16x1xi32>
    %26 = arith.sitofp %25 : vector<16x1xi32> to vector<16x1xf32>
    %27 = vector.extract_strided_slice %3 {offsets = [2, 0], sizes = [1, 128], strides = [1, 1]} : vector<8x128xf32> to vector<1x128xf32>
    %28 = vector.broadcast %26 : vector<16x1xf32> to vector<16x128xf32>
    %29 = vector.broadcast %27 : vector<1x128xf32> to vector<16x128xf32>
    %30 = arith.mulf %28, %29 : vector<16x128xf32>
    %31 = arith.addf %22, %30 : vector<16x128xf32>
    %c3_i32 = arith.constant 3 : i32
    %32 = vector.broadcast %c3_i32 : i32 to vector<16x1xi32>
    %33 = arith.cmpi eq, %0, %32 : vector<16x1xi32>
    %34 = arith.extui %33 : vector<16x1xi1> to vector<16x1xi32>
    %35 = arith.sitofp %34 : vector<16x1xi32> to vector<16x1xf32>
    %36 = vector.extract_strided_slice %3 {offsets = [3, 0], sizes = [1, 128], strides = [1, 1]} : vector<8x128xf32> to vector<1x128xf32>
    %37 = vector.broadcast %35 : vector<16x1xf32> to vector<16x128xf32>
    %38 = vector.broadcast %36 : vector<1x128xf32> to vector<16x128xf32>
    %39 = arith.mulf %37, %38 : vector<16x128xf32>
    %40 = arith.addf %31, %39 : vector<16x128xf32>
    %c4_i32 = arith.constant 4 : i32
    %41 = vector.broadcast %c4_i32 : i32 to vector<16x1xi32>
    %42 = arith.cmpi eq, %0, %41 : vector<16x1xi32>
    %43 = arith.extui %42 : vector<16x1xi1> to vector<16x1xi32>
    %44 = arith.sitofp %43 : vector<16x1xi32> to vector<16x1xf32>
    %45 = vector.extract_strided_slice %3 {offsets = [4, 0], sizes = [1, 128], strides = [1, 1]} : vector<8x128xf32> to vector<1x128xf32>
    %46 = vector.broadcast %44 : vector<16x1xf32> to vector<16x128xf32>
    %47 = vector.broadcast %45 : vector<1x128xf32> to vector<16x128xf32>
    %48 = arith.mulf %46, %47 : vector<16x128xf32>
    %49 = arith.addf %40, %48 : vector<16x128xf32>
    %c5_i32 = arith.constant 5 : i32
    %50 = vector.broadcast %c5_i32 : i32 to vector<16x1xi32>
    %51 = arith.cmpi eq, %0, %50 : vector<16x1xi32>
    %52 = arith.extui %51 : vector<16x1xi1> to vector<16x1xi32>
    %53 = arith.sitofp %52 : vector<16x1xi32> to vector<16x1xf32>
    %54 = vector.extract_strided_slice %3 {offsets = [5, 0], sizes = [1, 128], strides = [1, 1]} : vector<8x128xf32> to vector<1x128xf32>
    %55 = vector.broadcast %53 : vector<16x1xf32> to vector<16x128xf32>
    %56 = vector.broadcast %54 : vector<1x128xf32> to vector<16x128xf32>
    %57 = arith.mulf %55, %56 : vector<16x128xf32>
    %58 = arith.addf %49, %57 : vector<16x128xf32>
    %c6_i32 = arith.constant 6 : i32
    %59 = vector.broadcast %c6_i32 : i32 to vector<16x1xi32>
    %60 = arith.cmpi eq, %0, %59 : vector<16x1xi32>
    %61 = arith.extui %60 : vector<16x1xi1> to vector<16x1xi32>
    %62 = arith.sitofp %61 : vector<16x1xi32> to vector<16x1xf32>
    %63 = vector.extract_strided_slice %3 {offsets = [6, 0], sizes = [1, 128], strides = [1, 1]} : vector<8x128xf32> to vector<1x128xf32>
    %64 = vector.broadcast %62 : vector<16x1xf32> to vector<16x128xf32>
    %65 = vector.broadcast %63 : vector<1x128xf32> to vector<16x128xf32>
    %66 = arith.mulf %64, %65 : vector<16x128xf32>
    %67 = arith.addf %58, %66 : vector<16x128xf32>
    %c7_i32 = arith.constant 7 : i32
    %68 = vector.broadcast %c7_i32 : i32 to vector<16x1xi32>
    %69 = arith.cmpi eq, %0, %68 : vector<16x1xi32>
    %70 = arith.extui %69 : vector<16x1xi1> to vector<16x1xi32>
    %71 = arith.sitofp %70 : vector<16x1xi32> to vector<16x1xf32>
    %72 = vector.extract_strided_slice %3 {offsets = [7, 0], sizes = [1, 128], strides = [1, 1]} : vector<8x128xf32> to vector<1x128xf32>
    %73 = vector.broadcast %71 : vector<16x1xf32> to vector<16x128xf32>
    %74 = vector.broadcast %72 : vector<1x128xf32> to vector<16x128xf32>
    %75 = arith.mulf %73, %74 : vector<16x128xf32>
    %76 = arith.addf %67, %75 : vector<16x128xf32>
    %77 = arith.addf %1, %76 : vector<16x128xf32>
    %78 = arith.addf %77, %2 : vector<16x128xf32>
    %cst_7 = arith.constant 11.3137083 : f32
    %79 = vector.broadcast %cst_7 : f32 to vector<16x128xf32>
    %80 = arith.mulf %78, %79 : vector<16x128xf32>
    %c0_8 = arith.constant 0 : index
    %c0_9 = arith.constant 0 : index
    %81 = vector.load %arg5[%c0_8, %c0_9] : memref<16x128xf32, #tpu.memory_space<vmem>>, vector<16x128xf32>
    tpu.vector_store %arg5[%c0_8, %c0_9], %80 {strides = array<i32>} : memref<16x128xf32, #tpu.memory_space<vmem>>, vector<16x128xf32>,
    return
  }
  func.func @transform_0(%arg0: i32) -> (i32, i32) {
    %c0_i32 = arith.constant 0 : i32
    %c0_i32_0 = arith.constant 0 : i32
    return %arg0, %c0_i32 : i32, i32
  }
  func.func @transform_1(%arg0: i32) -> (i32, i32) {
    %c0_i32 = arith.constant 0 : i32
    %c0_i32_0 = arith.constant 0 : i32
    return %arg0, %c0_i32 : i32, i32
  }
  func.func @transform_2(%arg0: i32) -> (i32, i32) {
    %c0_i32 = arith.constant 0 : i32
    %c0_i32_0 = arith.constant 0 : i32
    return %arg0, %c0_i32 : i32, i32
  }
  func.func @transform_3(%arg0: i32) -> (i32, i32) {
    %c0_i32 = arith.constant 0 : i32
    %c0_i32_0 = arith.constant 0 : i32
    %c0_i32_1 = arith.constant 0 : i32
    return %c0_i32, %c0_i32_0 : i32, i32
  }
  func.func @transform_4(%arg0: i32) -> (i32, i32) {
    %c0_i32 = arith.constant 0 : i32
    %c0_i32_0 = arith.constant 0 : i32
    return %arg0, %c0_i32 : i32, i32
  }
}

</mosaic_0001>

<bundles_post_ra>
// kernel: tpu_custom_call.1
= control target key start
LH: loop header
LB: loop body
LE: loop exit
PB: predicated region body
PF: predicated region fallthrough
CT: control target
= control target key end

     0   :  { %9 = vsyncpa [#allocation3], 0  ;;  %s1107_s0 = inlined_call_operand.vmem [shape: s32[32,1], index: 0, kind: input, shape index: {}]   ;;  %s1108_s1 = inlined_call_operand.vmem [shape: f32[32,128], index: 1, kind: input, shape index: {}]   ;;  %s1109_s2 = inlined_call_operand.hbm [shape: f32[32,128], index: 2, kind: input, shape index: {}]   ;;  %s1110_s3 = inlined_call_operand.hbm [shape: f32[8,128], index: 3, kind: input, shape index: {}]   ;;  %s1111_s4 = inlined_call_operand.hbm [shape: f32[32,128], index: 4, kind: output, shape index: {}]  }
   0x1   :  { %11 = vsyncpa [#allocation3 + $0x1], 0 }
   0x2   :  { %12 = vsyncpa [#allocation6], 0 }
   0x3   :  { %13 = vsyncpa [#allocation4], 0 }
   0x4   :  { %15 = vsyncpa [#allocation4 + $0x1], 0  ;;  %s904_s15 = smov 0   ;;  %s906_s16 = smov 0  }
   0x5   :  { %s908_s17 = smov 0   ;;  %s910_s18 = smov 0  }
   0x6 LB: > { %s925_s19 = sadd.s32 4294967295, %s868_s18   ;;  %s603_s20 = sadd.s32 4294967294, %s868_s18   ;;  %s868_s18 = sphi %s910_s18, %s1134_s18   ;;  %s864_s17 = sphi %s908_s17, %s1133_s17   ;;  %s860_s16 = sphi %s906_s16, %s1132_s16   ;;  %s856_s15 = sphi %s904_s15, %s1131_s15  }
   0x7   : > { %s929_s21 = sadd.s32 1, %s868_s18   ;;  %s80_s22 = sadd.s32 1, %s864_s17 }
   0x8   : > { %s77_s23 = ssub.s32 %s868_s18, %s929_s21  ;;  %p87_p0 = scmp.ne.s32.totalorder %s864_s17, %s860_s16 }
   0x9   : > { %p78_p1 = scmp.eq.s32.totalorder %s77_s23, 0  ;;  %p88_p2 = scmp.eq.s32.totalorder %s868_s18, 0 }
   0xa   : > { %p93_p3 = scmp.ne.s32.totalorder %s860_s16, %s856_s15  ;;  %p1112_p4 = scmp.eq.s32.totalorder %s925_s19, 0 }
   0xb   : > { %s941_s24 = scalar_select %p78_p1, %s864_s17, %s80_s22  }
   0xc   : > { %p943_p5 = por %p88_p2, %p87_p0  ;;  %p949_p6 = por %p1112_p4, %p93_p3 }
   0xd   : > { %p138_p7 = scmp.eq.s32.totalorder %s925_s19, 1  ;;  %p144_p8 = scmp.eq.s32.totalorder %s603_s20, 1 }
   0xe   : > { %s1117_s26 = scalar_select %p949_p6, 1, 0 }
   0xf   : > { %p604_p9 = scmp.ge.s32.totalorder %s868_s18, 1  ;;  %p151_p10 = scmp.lt.s32.totalorder %s868_s18, 3 }
  0x10   : > { %p956_p11 = por %p138_p7, %p87_p0  ;;  %p960_p12 = por %p144_p8, %p93_p3 }
  0x11   : > { %p964_p13 = pnand %p604_p9, %p151_p10  ;;  %s870_s30 = smov [#allocation5]  }
  0x12   : > { %s1118_s27 = scalar_select %p956_p11, 1, 0 }
  0x13   : > { %s1119_s28 = scalar_select %p960_p12, 1, 0 }
  0x14   : > { %s1120_s29 = scalar_select %p964_p13, 1, 0 }
  0x15   : > { %p649_p2 = pneg %p964_p13  ;;  %s164_s5 = sshll.u32 %s870_s30, 4  ;;  %s165_s5 = int_to_ptr.vmem [resolvable:$true] %s164_s5 }
  0x16   : > { %p662_p4 = scmp.lt.s32.totalorder %s868_s18, 2  ;;  %p1121_p0 = scmp.eq.s32.totalorder %s925_s19, 0 }
  0x17   : > { %s193_s7 = sand.u32 1, %s864_s17   ;;  %s757_s10 = scalar_lea.vmem %s165_s5, 128 }
  0x18   : > { %p974_p7 = pnand %p649_p2, %p1121_p0  ;;  %p981_p3 = pnand %p662_p4, %p943_p5 }
  0x19   : > { %s607_s9 = sshll.u32 %s193_s7, 4  ;;  %p758_p9 = scmp.ne.s32.totalorder %s165_s5, %s757_s10 }
  0x1a   : > { %p748_p8 = pneg %p974_p7  ;;  %p765_p12 = scmp.lt.s32.totalorder %s165_s5, %s165_s5 }
  0x1b   : > { %p766_p11 = scmp.lt.s32.totalorder %s757_s10, %s757_s10 }
  0x1c   : > { %p760_p10 = pnand %p758_p9, %p748_p8 }
  0x1d   : > { %p767_p2 = por %p766_p11, %p765_p12 }
  0x1e   : > { %p761_p1 = pneg %p760_p10 }
  0x20   : > { %p768_p0 = pnand %p767_p2, %p761_p1 }
  0x22   : > { %771 = shalt.err (!%p768_p0)
}
  0x23   : > { %652 = dma.hbm_to_vmem [thread:$0]  (!%p974_p7), %s1110_s3, 128, %s165_s5, [#allocation6]  }
  0x24   : > { %s639_s13 = sshll.u32 %s868_s18, 8  ;;  %s197_s14 = scalar_lea.vmem [#allocation2], %s607_s9 }
  0x25   : > { %s204_s20 = sshll.u32 %s197_s14, 4  ;;  %s996_s25 = scalar_lea.hbm %s1109_s2, %s639_s13  ;;  %s998_s20 = int_to_ptr.vmem [resolvable:$true] %s204_s20 }
  0x26   : > { %s1000_s30 = scalar_lea.sflag [#allocation3], %s193_s7  ;;  %s772_s6 = scalar_lea.hbm %s996_s25, 256 }
  0x27   : > { %p773_p4 = scmp.ne.s32.totalorder %s996_s25, %s772_s6  ;;  %p774_p5 = pneg %p981_p3 }
  0x28   : > { %s777_s10 = scalar_lea.hbm %s1109_s2, 512  ;;  %p778_p1 = scmp.lt.s32.totalorder %s996_s25, %s1109_s2 }
  0x29   : > { %p775_p11 = pnand %p774_p5, %p773_p4  ;;  %p779_p7 = scmp.lt.s32.totalorder %s777_s10, %s772_s6 }
  0x2b   : > { %p776_p12 = pneg %p775_p11  ;;  %p780_p8 = por %p779_p7, %p778_p1 }
  0x2d   : > { %p781_p9 = pnand %p780_p8, %p776_p12 }
  0x2f   : > { %784 = shalt.err (!%p781_p9)
}
  0x30   : > { %s785_s7 = scalar_lea.vmem %s998_s20, 256  ;;  %s871_s13 = smov [#allocation2]  }
  0x31   : > { %p786_p10 = scmp.ne.s32.totalorder %s998_s20, %s785_s7  ;;  %s790_s14 = sshll.u32 %s871_s13, 4  ;;  %s791_s14 = int_to_ptr.vmem [resolvable:$false] %s790_s14 }
  0x32   : > { %s792_s22 = scalar_lea.vmem %s791_s14, 512  ;;  %p793_p4 = scmp.lt.s32.totalorder %s998_s20, %s791_s14 }
  0x33   : > { %p788_p2 = pnand %p786_p10, %p774_p5  ;;  %p794_p11 = scmp.lt.s32.totalorder %s792_s22, %s785_s7 }
  0x35   : > { %p789_p0 = pneg %p788_p2  ;;  %p795_p6 = por %p794_p11, %p793_p4 }
  0x37   : > { %p796_p13 = pnand %p795_p6, %p789_p0 }
  0x39   : > { %799 = shalt.err (!%p796_p13)
}
  0x3a   : > { %s872_s23 = smov 128   ;;  %s873_s6 = smov 8  }
  0x3b   : > { %656 = dma.hbm_to_vmem [thread:$0]  (!%p981_p3), %s996_s25, 256, %s998_s20, %s1000_s30, %s872_s23, %s872_s23, %s873_s6  }
  0x3c   : > { %p1124_p5 = scmp.ne.s32.totalorder %s1120_s29, 0 }
  0x3d   : > { %s1024_s5 = sand.u32 (!%p1124_p5), 1, %s860_s16   ;;  %p1125_p6 = scmp.ne.s32.totalorder (!%p1124_p5), %s1117_s26, 0 }
  0x3e   : > { %216 = sbr.rel (%p1124_p5) target bundleno = 248 (0xf8), region = 36  ;;  %s611_s9 = sshll.u32 (!%p1124_p5), %s1024_s5, 4 }
  0x3f   : > { %s219_s10 = scalar_lea.sflag (!%p1124_p5), [#allocation3], %s1024_s5  ;;  %s1030_s11 = scalar_lea.vmem (!%p1124_p5), [#allocation2], %s611_s9 }
  0x43   : > { %843 = dma.done.wait (%p1125_p6), %s219_s10, 256  }
  0x44   : > { %845 = vsyncadd (%p1125_p6), %s219_s10, 4294967040  ;;  %p1126_p13 = scmp.eq.s32.totalorder %s925_s19, 0 }
  0x46   : > { %847 = dma.done.wait (%p1126_p13), [#allocation6], 128   ;;  %p1127_p3 = pmov %p1126_p13 }
  0x47   : > { %s614_s29 = sshll.u32 %s925_s19, 1  ;;  %v874_v0 = vmov 0   ;;  %v875_v3 = vmov 0.0   ;;  %v298_v28 = vlaneseq  ;;  %v281_v31 = vld [vmem:[#allocation5] sm:$0xff]  ;;  %s640_s13 = sshll.u32 %s925_s19, 8 }
  0x48   : > { %849 = vsyncadd (%p1127_p3), [#allocation6], 4294967168  ;;  %715 = vset.pattern.permute.xlu1 %v874_v0  ;;  %704 = vset.pattern.permute.xlu0 %v874_v0  ;;  %p262_p12 = scmp.lt.s32.totalorder %s614_s29, 3  ;;  %s260_s14 = scalar_lea.vmem [#allocation7], %s611_s9 }
  0x49   : > { %v299_v29 = vshrl.u32 %v298_v28, 7  ;;  %s496_s22 = sshll.u32 %s260_s14, 4  ;;  %s1062_s10 = scalar_lea.hbm %s1111_s4, %s640_s13  ;;  %s1064_s22 = int_to_ptr.vmem [resolvable:$true] %s496_s22 }
  0x4a   : > { %s1136_s29 = smov (!%p262_p12, %s614_s29), 3  ;;  %s483_s19 = scalar_lea.sflag [#allocation4], %s1024_s5 }
  0x4b   : > { %s615_s8 = sshll.u32 %s1136_s29, 3  ;;  %v300_v30 = vsub.s32 0, %v299_v29  ;;  %v324_v32 = vsub.s32 1, %v299_v29  ;;  %v348_v33 = vsub.s32 2, %v299_v29  ;;  %v372_v39 = vsub.s32 3, %v299_v29  ;;  %p1128_p7 = scmp.ne.s32.totalorder %s1118_s27, 0 }
  0x4c   : > { %s265_s25 = scalar_lea.vmem %s1107_s0, %s615_s8  ;;  %v420_v44 = vsub.s32 5, %v299_v29  ;;  %v396_v45 = vsub.s32 4, %v299_v29  ;;  %v468_v61 = vsub.s32 7, %v299_v29  ;;  %v444_v62 = vsub.s32 6, %v299_v29  ;;  %s271_s7 = scalar_lea.vmem %s1108_s1, %s615_s8 }
  0x4d   : > { %v275_v1 = vld [vmem:[%s265_s25] sm:$0xff]  ;;  %v276_v2 = vld [vmem:[%s265_s25 + $0x8] sm:$0xff]  ;;  %v301_v36 = vrot.slane %v281_v31, %v300_v30  ;;  %v325_v40 = vrot.slane %v281_v31, %v324_v32  ;;  %v349_v41 = vrot.slane %v281_v31, %v348_v33  ;;  %v373_v52 = vrot.slane %v281_v31, %v372_v39  ;;  %s876_s9 = smov [#allocation7]  }
  0x4e   : > { %vm330_vm0 = vcmp.eq.s32.totalorder %v275_v1, 2  ;;  %vm331_vm1 = vcmp.eq.s32.totalorder %v276_v2, 2  ;;  %vm282_vm2 = vcmp.eq.s32.totalorder %v275_v1, 0  ;;  %vm283_vm3 = vcmp.eq.s32.totalorder %v276_v2, 0  ;;  %v279_v39 = vld [vmem:[%s1030_s11] sm:$0xff]  ;;  %s804_s29 = sshll.u32 %s876_s9, 4  ;;  %s805_s29 = int_to_ptr.vmem [resolvable:$false] %s804_s29 }
  0x4f   : > { %v622_v4 = vsel %vm330_vm0, 1.0, %v875_v3  ;;  %v623_v5 = vsel %vm331_vm1, 1.0, %v875_v3  ;;  %v618_v6 = vsel %vm282_vm2, 1.0, %v875_v3  ;;  %v619_v7 = vsel %vm283_vm3, 1.0, %v875_v3  ;;  %s806_s8 = scalar_lea.vmem %s805_s29, 512  ;;  %p807_p10 = scmp.lt.s32.totalorder %s1064_s22, %s805_s29 }
  0x50   : > { %v716_v8 = vpack.i.bf16 %v623_v5, %v622_v4  ;;  %v705_v9 = vpack.i.bf16 %v619_v7, %v618_v6  ;;  %vm354_vm4 = vcmp.eq.s32.totalorder %v275_v1, 3  ;;  %vm355_vm5 = vcmp.eq.s32.totalorder %v276_v2, 3 }
  0x51   : > { %v624_v10 = vsel %vm354_vm4, 1.0, %v875_v3  ;;  %v625_v11 = vsel %vm355_vm5, 1.0, %v875_v3  ;;  %vm306_vm6 = vcmp.eq.s32.totalorder %v275_v1, 1  ;;  %vm307_vm7 = vcmp.eq.s32.totalorder %v276_v2, 1 }
  0x52   : > { %717 = vperm.xlu1 %715, %v716_v8   ;;  %706 = vperm.xlu0 %704, %v705_v9   ;;  %v721_v12 = vpack.i.bf16 %v625_v11, %v624_v10  ;;  %v620_v13 = vsel %vm306_vm6, 1.0, %v875_v3  ;;  %v621_v14 = vsel %vm307_vm7, 1.0, %v875_v3  ;;  %vm402_vm8 = vcmp.eq.s32.totalorder %v275_v1, 5 }
  0x53   : > { %v710_v15 = vpack.i.bf16 %v621_v14, %v620_v13  ;;  %vm403_vm9 = vcmp.eq.s32.totalorder %v276_v2, 5  ;;  %v628_v16 = vsel %vm402_vm8, 1.0, %v875_v3  ;;  %vm378_vm10 = vcmp.eq.s32.totalorder %v275_v1, 4 }
  0x54   : > { %v629_v17 = vsel %vm403_vm9, 1.0, %v875_v3  ;;  %vm379_vm11 = vcmp.eq.s32.totalorder %v276_v2, 4  ;;  %v626_v18 = vsel %vm378_vm10, 1.0, %v875_v3  ;;  %vm450_vm12 = vcmp.eq.s32.totalorder %v275_v1, 7 }
  0x55   : > { %v627_v19 = vsel %vm379_vm11, 1.0, %v875_v3  ;;  %vm451_vm13 = vcmp.eq.s32.totalorder %v276_v2, 7  ;;  %v731_v20 = vpack.i.bf16 %v629_v17, %v628_v16  ;;  %vm426_vm14 = vcmp.eq.s32.totalorder %v275_v1, 6 }
  0x56   : > { %722 = vperm.xlu1 %715, %v721_v12   ;;  %711 = vperm.xlu0 %704, %v710_v15   ;;  %v726_v21 = vpack.i.bf16 %v627_v19, %v626_v18  ;;  %vm427_vm15 = vcmp.eq.s32.totalorder %v276_v2, 6  ;;  %v632_v22 = vsel %vm450_vm12, 1.0, %v875_v3  ;;  %v633_v23 = vsel %vm451_vm13, 1.0, %v875_v3 }
  0x57   : > { %v630_v24 = vsel %vm426_vm14, 1.0, %v875_v3  ;;  %v631_v25 = vsel %vm427_vm15, 1.0, %v875_v3  ;;  %v741_v26 = vpack.i.bf16 %v633_v23, %v632_v22  ;;  %v421_v57 = vrot.slane %v281_v31, %v420_v44 }
  0x58   : > { %v736_v27 = vpack.i.bf16 %v631_v25, %v630_v24  ;;  %v397_v59 = vrot.slane %v281_v31, %v396_v45  ;;  %v469_v11 = vrot.slane %v281_v31, %v468_v61  ;;  %v445_v13 = vrot.slane %v281_v31, %v444_v62 }
  0x5a   : > { %732 = vperm.xlu1 %715, %v731_v20   ;;  %727 = vperm.xlu0 %704, %v726_v21  }
  0x5e   : > { %742 = vperm.xlu1 %715, %v741_v26   ;;  %737 = vperm.xlu0 %704, %v736_v27  }
  0xcd   : > { %v718_v34 = vpop.permute.xlu1 %717  ;;  %v707_v35 = vpop.permute.xlu0 %706 }
  0xce   : > { %v709_v37 = vunpack.i.h.bf16 %v707_v35  ;;  %v708_v38 = vunpack.i.l.bf16 %v707_v35  ;;  %v720_v46 = vunpack.i.h.bf16 %v718_v34  ;;  %v719_v47 = vunpack.i.l.bf16 %v718_v34  ;;  %v277_v35 = vld [vmem:[%s271_s7] sm:$0xff] }
  0xd0   : > { %v303_v50 = vmul.f32 %v709_v37, %v301_v36  ;;  %v302_v51 = vmul.f32 %v708_v38, %v301_v36  ;;  %v351_v63 = vmul.f32 %v720_v46, %v349_v41  ;;  %v350_v0 = vmul.f32 %v719_v47, %v349_v41  ;;  %v278_v36 = vld [vmem:[%s271_s7 + $0x8] sm:$0xff] }
  0xd1   : > { %v723_v42 = vpop.permute.xlu1 %722  ;;  %v712_v43 = vpop.permute.xlu0 %711 }
  0xd2   : > { %v714_v48 = vunpack.i.h.bf16 %v712_v43  ;;  %v713_v49 = vunpack.i.l.bf16 %v712_v43  ;;  %v725_v53 = vunpack.i.h.bf16 %v723_v42  ;;  %v724_v54 = vunpack.i.l.bf16 %v723_v42 }
  0xd4   : > { %v327_v55 = vmul.f32 %v714_v48, %v325_v40  ;;  %v326_v56 = vmul.f32 %v713_v49, %v325_v40  ;;  %v375_v7 = vmul.f32 %v725_v53, %v373_v52  ;;  %v374_v8 = vmul.f32 %v724_v54, %v373_v52  ;;  %v280_v40 = vld [vmem:[%s1030_s11 + $0x8] sm:$0xff]  ;;  %s800_s11 = scalar_lea.vmem %s1064_s22, 256 }
  0xd5   : > { %v733_v58 = vpop.permute.xlu1 %732  ;;  %v728_v60 = vpop.permute.xlu0 %727  ;;  %p801_p1 = scmp.ne.s32.totalorder %s1064_s22, %s800_s11  ;;  %p808_p2 = scmp.lt.s32.totalorder %s806_s8, %s800_s11 }
  0xd6   : > { %v328_v1 = vadd.f32 %v326_v56, %v302_v51  ;;  %v329_v2 = vadd.f32 %v327_v55, %v303_v50  ;;  %v735_v3 = vunpack.i.h.bf16 %v733_v58  ;;  %v734_v4 = vunpack.i.l.bf16 %v733_v58 }
  0xd7   : > { %v730_v5 = vunpack.i.h.bf16 %v728_v60  ;;  %v729_v6 = vunpack.i.l.bf16 %v728_v60  ;;  %p802_p8 = pnand %p801_p1, %p1128_p7  ;;  %p809_p0 = por %p808_p2, %p807_p10 }
  0xd8   : > { %v352_v9 = vadd.f32 %v350_v0, %v328_v1  ;;  %v353_v10 = vadd.f32 %v351_v63, %v329_v2  ;;  %v423_v19 = vmul.f32 %v735_v3, %v421_v57  ;;  %v422_v20 = vmul.f32 %v734_v4, %v421_v57 }
  0xd9   : > { %v743_v12 = vpop.permute.xlu1 %742  ;;  %v738_v14 = vpop.permute.xlu0 %737  ;;  %v399_v15 = vmul.f32 %v730_v5, %v397_v59  ;;  %v398_v18 = vmul.f32 %v729_v6, %v397_v59  ;;  %p803_p9 = pneg %p802_p8 }
  0xda   : > { %v376_v16 = vadd.f32 %v374_v8, %v352_v9  ;;  %v377_v17 = vadd.f32 %v375_v7, %v353_v10  ;;  %v740_v21 = vunpack.i.h.bf16 %v738_v14  ;;  %v739_v22 = vunpack.i.l.bf16 %v738_v14 }
  0xdb   : > { %v745_v25 = vunpack.i.h.bf16 %v743_v12  ;;  %v744_v26 = vunpack.i.l.bf16 %v743_v12  ;;  %p810_p4 = pnand %p809_p0, %p803_p9 }
  0xdc   : > { %v400_v23 = vadd.f32 %v398_v18, %v376_v16  ;;  %v401_v24 = vadd.f32 %v399_v15, %v377_v17  ;;  %v447_v27 = vmul.f32 %v740_v21, %v445_v13  ;;  %v446_v30 = vmul.f32 %v739_v22, %v445_v13 }
  0xdd   : > { %v471_v31 = vmul.f32 %v745_v25, %v469_v11  ;;  %v470_v32 = vmul.f32 %v744_v26, %v469_v11 }
  0xde   : > { %v424_v28 = vadd.f32 %v422_v20, %v400_v23  ;;  %v425_v29 = vadd.f32 %v423_v19, %v401_v24 }
  0xe0   : > { %v448_v33 = vadd.f32 %v446_v30, %v424_v28  ;;  %v449_v34 = vadd.f32 %v447_v27, %v425_v29 }
  0xe2   : > { %v472_v37 = vadd.f32 %v470_v32, %v448_v33  ;;  %v473_v38 = vadd.f32 %v471_v31, %v449_v34 }
  0xe4   : > { %v474_v41 = vadd.f32 %v472_v37, %v277_v35  ;;  %v475_v42 = vadd.f32 %v473_v38, %v278_v36 }
  0xe6   : > { %v476_v43 = vadd.f32 %v474_v41, %v279_v39  ;;  %v477_v44 = vadd.f32 %v475_v42, %v280_v40 }
  0xe8   : > { %v478_v45 = vmul.f32 11.313708, %v476_v43  ;;  %v479_v46 = vmul.f32 11.313708, %v477_v44 }
  0xea   : > { %480 = vst [vmem:[%s260_s14] sm:$0xff] %v478_v45  ;;  %481 = vst [vmem:[%s260_s14 + $0x8] sm:$0xff] %v479_v46 }
  0xeb   : > { %813 = shalt.err (!%p810_p4)
}
  0xec   : > { %s814_s26 = scalar_lea.hbm %s1062_s10, 256  ;;  %s818_s30 = scalar_lea.hbm %s1111_s4, 512 }
  0xed   : > { %p815_p11 = scmp.ne.s32.totalorder %s1062_s10, %s814_s26  ;;  %p819_p13 = scmp.lt.s32.totalorder %s1062_s10, %s1111_s4 }
  0xee   : > { %p820_p3 = scmp.lt.s32.totalorder %s818_s30, %s814_s26 }
  0xef   : > { %p816_p5 = pnand %p815_p11, %p1128_p7 }
  0xf0   : > { %p821_p12 = por %p820_p3, %p819_p13 }
  0xf1   : > { %p817_p6 = pneg %p816_p5 }
  0xf3   : > { %p822_p1 = pnand %p821_p12, %p817_p6 }
  0xf5   : > { %825 = shalt.err (!%p822_p1)
}
  0xf6   : > { %s877_s13 = smov 128   ;;  %s878_s14 = smov 8  }
  0xf7   : > { %647 = dma.vmem_to_hbm [thread:$0]  (%p1128_p7), %s1064_s22, 256, %s1062_s10, %s483_s19, %s877_s13, %s877_s13, %s878_s14  }
  0xf8 PF: > { %s511_s23 = sand.u32 1, %s856_s15   ;;  %p1129_p8 = scmp.ne.s32.totalorder %s1119_s28, 0 }
  0xf9   : > { %p1130_p9 = scmp.ge.s32.totalorder %s868_s18, 2  ;;  %s512_s6 = scalar_lea.sflag [#allocation4], %s511_s23 }
  0xfb   : > { %p658_p10 = pnand %p1130_p9, %p1129_p8 }
  0xfd   : > { %p659_p2 = pneg %p658_p10 }
  0xff   : > { %851 = dma.done.wait (%p659_p2), %s512_s6, 256  }
 0x100   : > { %853 = vsyncadd (%p659_p2), %s512_s6, 4294967040  ;;  %p18_p0 = scmp.ge.s32.totalorder %s929_s21, 4   ;;  %s1131_s15 = smov %s860_s16 }
 0x101   : > { %s1132_s16 = smov %s864_s17  ;;  %s1133_s17 = smov %s941_s24 }
 0x102   : > { %s1134_s18 = smov %s929_s21  ;;  %20 = sbr.rel (!%p18_p0) target bundleno = 6 (0x6), region = 91 }
 0x107   :  { %517 = vsyncpa [#allocation3], 1 }
 0x108   :  { %519 = vsyncpa [#allocation3 + $0x1], 1 }
 0x109   :  { %520 = vsyncpa [#allocation6], 1 }
 0x10a   :  { %521 = vsyncpa [#allocation4], 1 }
 0x10b   :  { %523 = vsyncpa [#allocation4 + $0x1], 1 }

</bundles_post_ra>
